<compile_context>
chip_gen: v7x
topology: tpu7x:2x2x1
jax: 0.10.0
libtpu: 0.0.40
codegen_flags: <defaults>
</compile_context>

<pallas_src>
import jax
import jax.numpy as jnp
from jax.experimental import pallas as pl
from jax.experimental.pallas import tpu as pltpu


def _build_interp_matrix(in_size, out_size, mode, align_corners, dtype=jnp.float32):
    """Build (out_size, in_size) interpolation matrix matching F.interpolate."""
    if mode == "nearest":
        # PyTorch nearest (size-based path): src = floor(dst * in/out)
        src = jnp.floor(jnp.arange(out_size, dtype=jnp.float32)
                        * (in_size / out_size)).astype(jnp.int32)
        src = jnp.clip(src, 0, in_size - 1)
        return jax.nn.one_hot(src, in_size, dtype=dtype)
    elif mode == "bilinear":
        if align_corners:
            if out_size == 1:
                src = jnp.zeros((out_size,), jnp.float32)
            else:
                src = jnp.arange(out_size, dtype=jnp.float32) * (
                    (in_size - 1) / (out_size - 1))
        else:
            src = (jnp.arange(out_size, dtype=jnp.float32) + 0.5) * (
                in_size / out_size) - 0.5
            src = jnp.maximum(src, 0.0)
        lo = jnp.clip(jnp.floor(src).astype(jnp.int32), 0, in_size - 1)
        hi = jnp.clip(lo + 1, 0, in_size - 1)
        w_hi = src - lo.astype(jnp.float32)
        w_lo = 1.0 - w_hi
        m = (jax.nn.one_hot(lo, in_size, dtype=jnp.float32) * w_lo[:, None]
             + jax.nn.one_hot(hi, in_size, dtype=jnp.float32) * w_hi[:, None])
        return m.astype(dtype)
    else:
        # TODO(synk): modes like 'bicubic'/'area'/'trilinear' are not implemented.
        raise NotImplementedError(f"mode={mode}")


def _upsample_kernel(x_ref, wh_ref, wwt_ref, o_ref):
    # x_ref:   (planes*H, W)        batch of planes, flattened along rows
    # wh_ref:  (Hout, H)            row interpolation matrix
    # wwt_ref: (W, Wout)            column interpolation matrix (transposed)
    # o_ref:   (planes*Hout, Wout)
    h_out, h = wh_ref.shape
    planes = x_ref.shape[0] // h
    cdt = wwt_ref.dtype

    x = x_ref[...]
    if x.dtype != cdt:
        x = x.astype(cdt)

    # Column interpolation, folded over the whole plane batch: one big MXU
    # matmul with M = planes*H, K = W, N = Wout.
    tmp = jnp.dot(x, wwt_ref[...], preferred_element_type=jnp.float32)
    tmp = tmp.astype(cdt)

    wh = wh_ref[...]
    # Row interpolation per plane (static unroll; `planes` is small).
    for p in range(planes):
        rows = tmp[p * h:(p + 1) * h, :]
        o_ref[p * h_out:(p + 1) * h_out, :] = jnp.dot(
            wh, rows, preferred_element_type=jnp.float32).astype(o_ref.dtype)


def _choose_planes_per_block(nc, h, w, h_out, w_out, itemsize):
    """Largest divisor of nc that fits a conservative VMEM budget and the
    (8, 128) BlockSpec layout rule on the flattened 2-D blocks."""
    # Per-plane VMEM: double-buffered input + output blocks + f32 intermediate.
    per_plane = 2 * (h * w + h_out * w_out) * itemsize + h * w_out * 4
    fixed = 2 * (h_out * h + w * w_out) * 4        # interp matrices (dbl-buffered)
    budget = 24 * 1024 * 1024                      # safe on v5e/v6e/v7x scoped VMEM
    cap = max(1, min(32, (budget - fixed) // max(per_plane, 1)))
    if nc >= 2:
        # Keep >= 2 grid steps so v7x's two TensorCores both get work.
        cap = min(cap, max(1, nc // 2))

    # Sublane granularity of the block's second-minor dim (8 for f32, 16 bf16).
    sub = 8 * max(1, 4 // max(itemsize, 1))

    def ok(d):
        # Second-minor block dims must be multiples of the sublane tile unless
        # the block spans the full array dimension (d == nc).
        return d == nc or ((d * h) % sub == 0 and (d * h_out) % sub == 0)

    best = None
    for d in range(1, min(cap, nc) + 1):
        if nc % d == 0 and ok(d):
            best = d
    if best is None:
        # Fall back to the smallest legal divisor (may exceed the soft budget).
        for d in range(1, nc + 1):
            if nc % d == 0 and ok(d):
                best = d
                break
    return best


def _pallas_resize(x, wh, wwt, h_out, w_out):
    n, c, h, w = x.shape
    nc = n * c
    itemsize = jnp.dtype(x.dtype).itemsize
    planes = _choose_planes_per_block(nc, h, w, h_out, w_out, itemsize)

    # Flatten planes into rows so the kernel sees simple 2-D blocks.
    x2 = x.reshape(nc * h, w)

    out2 = pl.pallas_call(
        _upsample_kernel,
        out_shape=jax.ShapeDtypeStruct((nc * h_out, w_out), x.dtype),
        grid_spec=pltpu.PrefetchScalarGridSpec(
            num_scalar_prefetch=0,
            grid=(nc // planes,),
            in_specs=[
                pl.BlockSpec((planes * h, w), lambda i: (i, 0)),
                pl.BlockSpec((h_out, h), lambda i: (0, 0)),
                pl.BlockSpec((w, w_out), lambda i: (0, 0)),
            ],
            out_specs=pl.BlockSpec((planes * h_out, w_out), lambda i: (i, 0)),
        ),
        compiler_params=pltpu.CompilerParams(
            dimension_semantics=("parallel",),
            vmem_limit_bytes=48 * 1024 * 1024,
        ),
    )(x2, wh, wwt)
    return out2.reshape(n, c, h_out, w_out)


class Upsample:
    """JAX/Pallas port of mmseg.ops.wrappers.Upsample (nearest / bilinear)."""

    def __init__(self, size=None, scale_factor=None, mode="nearest",
                 align_corners=None):
        self.size = size
        if isinstance(scale_factor, tuple):
            self.scale_factor = tuple(float(f) for f in scale_factor)
        else:
            self.scale_factor = float(scale_factor) if scale_factor else None
        self.mode = mode
        self.align_corners = align_corners

    def __call__(self, x):
        if self.mode == "nearest" and self.align_corners is not None:
            raise ValueError(
                "align_corners option can only be set with the interpolating "
                "modes: linear | bilinear | bicubic | trilinear")

        if not self.size:
            if isinstance(self.scale_factor, tuple):
                sf_h, sf_w = self.scale_factor
            else:
                sf_h = sf_w = self.scale_factor
            size = [int(x.shape[-2] * sf_h), int(x.shape[-1] * sf_w)]
        else:
            size = self.size
            if isinstance(size, int):
                size = (size, size)
        h_out, w_out = int(size[0]), int(size[1])
        h_in, w_in = x.shape[-2], x.shape[-1]

        # Build interpolation matrices in the MXU-friendly compute dtype.
        if x.dtype in (jnp.bfloat16, jnp.float32):
            compute_dtype = x.dtype
        else:
            # TODO(synk): integer-dtype bilinear truncates rather than rounds
            # (PyTorch rounds); nearest on integers is exact.
            compute_dtype = jnp.float32

        wh = _build_interp_matrix(h_in, h_out, self.mode, self.align_corners,
                                  dtype=compute_dtype)
        ww = _build_interp_matrix(w_in, w_out, self.mode, self.align_corners,
                                  dtype=compute_dtype)
        return _pallas_resize(x, wh, ww.T, h_out, w_out)


# -------------------- plain-JAX references for checking --------------------

def _ref_nearest(x, h_out, w_out):
    h_in, w_in = x.shape[-2], x.shape[-1]
    src_h = jnp.clip(jnp.floor(jnp.arange(h_out) * (h_in / h_out)).astype(jnp.int32),
                     0, h_in - 1)
    src_w = jnp.clip(jnp.floor(jnp.arange(w_out) * (w_in / w_out)).astype(jnp.int32),
                     0, w_in - 1)
    return jnp.take(jnp.take(x, src_h, axis=-2), src_w, axis=-1)


def _ref_bilinear(x, h_out, w_out, align_corners):
    h_in, w_in = x.shape[-2], x.shape[-1]

    def coords(in_size, out_size):
        if align_corners:
            src = jnp.arange(out_size, dtype=jnp.float32) * (
                (in_size - 1) / max(out_size - 1, 1))
        else:
            src = jnp.maximum(
                (jnp.arange(out_size, dtype=jnp.float32) + 0.5)
                * (in_size / out_size) - 0.5, 0.0)
        lo = jnp.clip(jnp.floor(src).astype(jnp.int32), 0, in_size - 1)
        hi = jnp.clip(lo + 1, 0, in_size - 1)
        w_hi = src - lo.astype(jnp.float32)
        return lo, hi, w_hi

    hlo, hhi, hw = coords(h_in, h_out)
    wlo, whi, ww = coords(w_in, w_out)

    top = jnp.take(x, hlo, axis=-2)
    bot = jnp.take(x, hhi, axis=-2)
    rows = top * (1.0 - hw)[:, None] + bot * hw[:, None]
    left = jnp.take(rows, wlo, axis=-1)
    right = jnp.take(rows, whi, axis=-1)
    return left * (1.0 - ww) + right * ww


if __name__ == "__main__":
    key = jax.random.PRNGKey(0)
    x = jax.random.normal(key, (2, 4, 16, 16), dtype=jnp.float32)

    # nearest, scale_factor=2 (module default mode='nearest')
    up_nearest = Upsample(scale_factor=2, mode="nearest")
    y_near = up_nearest(x)
    jax.block_until_ready(y_near)
    assert y_near.shape == (2, 4, 32, 32)
    ref_near = _ref_nearest(x, 32, 32)
    assert jnp.allclose(y_near, ref_near, atol=1e-5, rtol=1e-5)

    # bilinear, align_corners=False, explicit size
    up_bilin = Upsample(size=(32, 32), mode="bilinear", align_corners=False)
    y_bil = up_bilin(x)
    jax.block_until_ready(y_bil)
    assert y_bil.shape == (2, 4, 32, 32)
    ref_bil = _ref_bilinear(x, 32, 32, align_corners=False)
    assert jnp.allclose(y_bil, ref_bil, atol=1e-5, rtol=1e-5)

    # bilinear, align_corners=True, odd channel count / non-square output
    key2 = jax.random.PRNGKey(1)
    x3 = jax.random.normal(key2, (1, 3, 16, 16), dtype=jnp.float32)
    up_ac = Upsample(size=(24, 40), mode="bilinear", align_corners=True)
    y_ac = up_ac(x3)
    jax.block_until_ready(y_ac)
    assert y_ac.shape == (1, 3, 24, 40)
    ref_ac = _ref_bilinear(x3, 24, 40, align_corners=True)
    assert jnp.allclose(y_ac, ref_ac, atol=1e-5, rtol=1e-5)

    print("KERNEL_OK")
</pallas_src>

<mosaic_0001>
module attributes {stable_mosaic.version = 11 : i64} {
  func.func @_upsample_kernel(%arg0: i32, %arg1: memref<64x16xf32, #tpu.memory_space<vmem>>, %arg2: memref<32x16xf32, #tpu.memory_space<vmem>>, %arg3: memref<16x32xf32, #tpu.memory_space<vmem>>, %arg4: memref<128x32xf32, #tpu.memory_space<vmem>>) attributes {dimension_semantics = [#tpu.dimension_semantics<parallel>], iteration_bounds = array<i64: 2>, scalar_prefetch = 0 : i64, scratch_operands = 0 : i64, tpu.core_type = #tpu.core_type<tc>, window_params = [{transform_indices = @transform_0, window_bounds = array<i64: 64, 16>}, {pipeline_mode = #tpu.pipeline_mode<synchronous>, transform_indices = @transform_1, window_bounds = array<i64: 32, 16>}, {pipeline_mode = #tpu.pipeline_mode<synchronous>, transform_indices = @transform_2, window_bounds = array<i64: 16, 32>}, {transform_indices = @transform_3, window_bounds = array<i64: 128, 32>}]} {
    %c0 = arith.constant 0 : index
    %c0_0 = arith.constant 0 : index
    %0 = vector.load %arg1[%c0, %c0_0] : memref<64x16xf32, #tpu.memory_space<vmem>>, vector<64x16xf32>
    %c0_1 = arith.constant 0 : index
    %c0_2 = arith.constant 0 : index
    %1 = vector.load %arg3[%c0_1, %c0_2] : memref<16x32xf32, #tpu.memory_space<vmem>>, vector<16x32xf32>
    %cst = arith.constant dense<0.000000e+00> : vector<64x32xf32>
    %2 = tpu.matmul %0, %1, %cst {dimension_numbers = #tpu.dot_dimension_numbers<[1], [0], [0], [1], [0, 0, 1, 1], [], []>} : vector<64x16xf32>, vector<16x32xf32>, vector<64x32xf32> -> vector<64x32xf32>
    %c0_3 = arith.constant 0 : index
    %c0_4 = arith.constant 0 : index
    %3 = vector.load %arg2[%c0_3, %c0_4] : memref<32x16xf32, #tpu.memory_space<vmem>>, vector<32x16xf32>
    %4 = vector.extract_strided_slice %2 {offsets = [0, 0], sizes = [16, 32], strides = [1, 1]} : vector<64x32xf32> to vector<16x32xf32>
    %cst_5 = arith.constant dense<0.000000e+00> : vector<32x32xf32>
    %5 = tpu.matmul %3, %4, %cst_5 {dimension_numbers = #tpu.dot_dimension_numbers<[1], [0], [0], [1], [0, 0, 1, 1], [], []>} : vector<32x16xf32>, vector<16x32xf32>, vector<32x32xf32> -> vector<32x32xf32>
    %c0_6 = arith.constant 0 : index
    %c0_7 = arith.constant 0 : index
    %6 = vector.load %arg4[%c0_6, %c0_7] : memref<128x32xf32, #tpu.memory_space<vmem>>, vector<32x32xf32>
    tpu.vector_store %arg4[%c0_6, %c0_7], %5 {strides = array<i32>} : memref<128x32xf32, #tpu.memory_space<vmem>>, vector<32x32xf32>,
    %7 = vector.extract_strided_slice %2 {offsets = [16, 0], sizes = [16, 32], strides = [1, 1]} : vector<64x32xf32> to vector<16x32xf32>
    %cst_8 = arith.constant dense<0.000000e+00> : vector<32x32xf32>
    %8 = tpu.matmul %3, %7, %cst_8 {dimension_numbers = #tpu.dot_dimension_numbers<[1], [0], [0], [1], [0, 0, 1, 1], [], []>} : vector<32x16xf32>, vector<16x32xf32>, vector<32x32xf32> -> vector<32x32xf32>
    %c32 = arith.constant 32 : index
    %c0_9 = arith.constant 0 : index
    %9 = vector.load %arg4[%c32, %c0_9] : memref<128x32xf32, #tpu.memory_space<vmem>>, vector<32x32xf32>
    tpu.vector_store %arg4[%c32, %c0_9], %8 {strides = array<i32>} : memref<128x32xf32, #tpu.memory_space<vmem>>, vector<32x32xf32>,
    %10 = vector.extract_strided_slice %2 {offsets = [32, 0], sizes = [16, 32], strides = [1, 1]} : vector<64x32xf32> to vector<16x32xf32>
    %cst_10 = arith.constant dense<0.000000e+00> : vector<32x32xf32>
    %11 = tpu.matmul %3, %10, %cst_10 {dimension_numbers = #tpu.dot_dimension_numbers<[1], [0], [0], [1], [0, 0, 1, 1], [], []>} : vector<32x16xf32>, vector<16x32xf32>, vector<32x32xf32> -> vector<32x32xf32>
    %c64 = arith.constant 64 : index
    %c0_11 = arith.constant 0 : index
    %12 = vector.load %arg4[%c64, %c0_11] : memref<128x32xf32, #tpu.memory_space<vmem>>, vector<32x32xf32>
    tpu.vector_store %arg4[%c64, %c0_11], %11 {strides = array<i32>} : memref<128x32xf32, #tpu.memory_space<vmem>>, vector<32x32xf32>,
    %13 = vector.extract_strided_slice %2 {offsets = [48, 0], sizes = [16, 32], strides = [1, 1]} : vector<64x32xf32> to vector<16x32xf32>
    %cst_12 = arith.constant dense<0.000000e+00> : vector<32x32xf32>
    %14 = tpu.matmul %3, %13, %cst_12 {dimension_numbers = #tpu.dot_dimension_numbers<[1], [0], [0], [1], [0, 0, 1, 1], [], []>} : vector<32x16xf32>, vector<16x32xf32>, vector<32x32xf32> -> vector<32x32xf32>
    %c96 = arith.constant 96 : index
    %c0_13 = arith.constant 0 : index
    %15 = vector.load %arg4[%c96, %c0_13] : memref<128x32xf32, #tpu.memory_space<vmem>>, vector<32x32xf32>
    tpu.vector_store %arg4[%c96, %c0_13], %14 {strides = array<i32>} : memref<128x32xf32, #tpu.memory_space<vmem>>, vector<32x32xf32>,
    return
  }
  func.func @transform_0(%arg0: i32) -> (i32, i32) {
    %c0_i32 = arith.constant 0 : i32
    %c0_i32_0 = arith.constant 0 : i32
    return %arg0, %c0_i32 : i32, i32
  }
  func.func @transform_1(%arg0: i32) -> (i32, i32) {
    %c0_i32 = arith.constant 0 : i32
    %c0_i32_0 = arith.constant 0 : i32
    %c0_i32_1 = arith.constant 0 : i32
    return %c0_i32, %c0_i32_0 : i32, i32
  }
  func.func @transform_2(%arg0: i32) -> (i32, i32) {
    %c0_i32 = arith.constant 0 : i32
    %c0_i32_0 = arith.constant 0 : i32
    %c0_i32_1 = arith.constant 0 : i32
    return %c0_i32, %c0_i32_0 : i32, i32
  }
  func.func @transform_3(%arg0: i32) -> (i32, i32) {
    %c0_i32 = arith.constant 0 : i32
    %c0_i32_0 = arith.constant 0 : i32
    return %arg0, %c0_i32 : i32, i32
  }
}

</mosaic_0001>

<bundles_post_ra>
// kernel: tpu_custom_call.1
= control target key start
LH: loop header
LB: loop body
LE: loop exit
PB: predicated region body
PF: predicated region fallthrough
CT: control target
= control target key end

     0   :  { %s924_s12 = smov 0   ;;  %s1021_s0 = inlined_call_operand.vmem [shape: f32[128,16], index: 0, kind: input, shape index: {}]   ;;  %s1022_s1 = inlined_call_operand.vmem [shape: f32[32,16], index: 1, kind: input, shape index: {}]   ;;  %s1023_s2 = inlined_call_operand.vmem [shape: f32[16,32], index: 2, kind: input, shape index: {}]   ;;  %s1024_s3 = inlined_call_operand.vmem [shape: f32[256,32], index: 3, kind: output, shape index: {}]  }
   0x1 LB: > { %s743_s13 = sadd.s32 4294967295, %s902_s12   ;;  %p747_p0 = scmp.ge.s32.totalorder %s902_s12, 1  ;;  %s902_s12 = sphi %s924_s12, %s13_s12  }
   0x2   : > { %p138_p1 = scmp.lt.s32.totalorder %s902_s12, 3 }
   0x4   : > { %p139_p2 = pnand %p747_p0, %p138_p1 }
   0x5   : > { %v182_v0 = vld [vmem:[%s1023_s2] sm:$0xff] (!%p139_p2)  ;;  %v183_v1 = vld [vmem:[%s1023_s2 + $0x8] sm:$0xff] (!%p139_p2)  ;;  %s748_s18 = sshll.u32 (!%p139_p2), %s743_s13, 3  ;;  %vm184_vm0 = vcmask (!%p139_p2), 130048   ;;  %v316_v19 = vld [vmem:[%s1022_s1 + $0x10] sm:$0xff] (!%p139_p2)  ;;  %s750_s4 = sshll.u32 (!%p139_p2), %s743_s13, 4 }
   0x6   : > { %142 = sbr.rel (%p139_p2) target bundleno = 471 (0x1d7), region = 32  ;;  %v868_v2 = vpack.c.bf16 (!%p139_p2), %v183_v1, %v182_v0  ;;  %p163_p3 = scmp.lt.s32.totalorder (!%p139_p2), %s748_s18, 15  ;;  %v314_v11 = vld [vmem:[%s1022_s1] sm:$0xff] (!%p139_p2)  ;;  %v315_v17 = vld [vmem:[%s1022_s1 + $0x8] sm:$0xff] (!%p139_p2)  ;;  %v317_v22 = vld [vmem:[%s1022_s1 + $0x18] sm:$0xff] (!%p139_p2)  ;;  %vm415_vm1 = vcmask (!%p139_p2), 261120  }
   0x7   : > { %832 = vmatprep.mubr.msk.f32.mxu1 (!%p139_p2), %vm184_vm0, %v314_v11  ;;  %p169_p4 = scmp.lt.s32.totalorder (!%p139_p2), %s750_s4, 31 }
   0x8   : > { %869 = vmatprep.subr.bf16.mxu0 (!%p139_p2), %v868_v2 }
   0x9   : > { %871 = vmatpush3.bf16.msra.mxu0 (!%p139_p2), %v868_v2 }
   0xd   : > { %s1026_s18 = smov (!%p163_p3, %s748_s18), 15  ;;  %s1028_s4 = smov (!%p169_p4, %s750_s4), 31 }
   0xe   : > { %s749_s19 = sshll.u32 %s1026_s18, 3  ;;  %s751_s5 = sshll.u32 %s1028_s4, 3 }
   0xf   : > { %s166_s22 = scalar_lea.vmem %s1021_s0, %s749_s19  ;;  %s984_s8 = scalar_lea.vmem %s1024_s3, %s751_s5 }
  0x10   : > { %v174_v3 = vld [vmem:[%s166_s22] sm:$0xff]  ;;  %v175_v4 = vld [vmem:[%s166_s22 + $0x8] sm:$0xff]  ;;  %v176_v5 = vld [vmem:[%s166_s22 + $0x10] sm:$0xff] }
  0x11   : > { %816 = vmatprep.mubr.msk.f32.mxu0 %vm184_vm0, %v174_v3  ;;  %v177_v6 = vld [vmem:[%s166_s22 + $0x18] sm:$0xff]  ;;  %v178_v7 = vld [vmem:[%s166_s22 + $0x20] sm:$0xff]  ;;  %v179_v8 = vld [vmem:[%s166_s22 + $0x28] sm:$0xff] }
  0x12   : > { %817 = vmatmul.mubr.msk.f32.vlgmr.msra.gmra.mrb[0].mxu0 %vm184_vm0, %v175_v4  ;;  %v180_v9 = vld [vmem:[%s166_s22 + $0x30] sm:$0xff]  ;;  %v181_v10 = vld [vmem:[%s166_s22 + $0x38] sm:$0xff] }
  0x13   : > { %819 = vmatprep.mubr.msk.f32.mxu0 %vm184_vm0, %v176_v5 }
  0x16   : > { %820 = vmatmul.mubr.msk.f32.gmra.mrb[2].mxu0 %vm184_vm0, %v177_v6 }
  0x17   : > { %822 = vmatprep.mubr.msk.f32.mxu0 %vm184_vm0, %v178_v7 }
  0x1a   : > { %823 = vmatmul.mubr.msk.f32.gmra.mrb[4].mxu0 %vm184_vm0, %v179_v8 }
  0x1b   : > { %825 = vmatprep.mubr.msk.f32.mxu0 %vm184_vm0, %v180_v9 }
  0x1e   : > { %826 = vmatmul.mubr.msk.f32.gmra.mrb[6].mxu0 %vm184_vm0, %v181_v10 }
  0x1f   : > { %852 = vmatprep.mubr.msk.f32.mxu0 %vm184_vm0, %v314_v11 }
  0xe5   : > { %v818_v12 = vpop.f32.mrb[0].mxu0 }
  0xe6   : > { %v275_v13 = vpop.f32.mrb[1].mxu0 }
  0xe7   : > { %v872_v14 = vpack.c.bf16 %v818_v12, %v275_v13 }
  0xe9   : > { %v821_v15 = vpop.f32.mrb[2].mxu0  ;;  %873 = vmatprep.subr.bf16.mxu1 %v872_v14 }
  0xea   : > { %v285_v16 = vpop.f32.mrb[3].mxu0  ;;  %875 = vmatpush3.bf16.msra.mxu1 %v872_v14 }
  0xeb   : > { %v876_v18 = vpack.c.bf16 %v821_v15, %v285_v16 }
  0xed   : > { %v824_v20 = vpop.f32.mrb[4].mxu0  ;;  %877 = vmatprep.subr.bf16.mxu1 %v876_v18  ;;  %833 = vmatmul.mubr.msk.f32.vlgmr.msra.gmra.mrb[0].mxu1 %vm184_vm0, %v315_v17 }
  0xee   : > { %v295_v21 = vpop.f32.mrb[5].mxu0  ;;  %879 = vmatpush3.bf16.msra.mxu1 %v876_v18  ;;  %835 = vmatprep.mubr.msk.f32.mxu1 %vm184_vm0, %v316_v19 }
  0xef   : > { %v880_v23 = vpack.c.bf16 %v824_v20, %v295_v21 }
  0xf1   : > { %881 = vmatprep.subr.bf16.mxu0 %v880_v23  ;;  %v827_v24 = vpop.f32.mrb[6].mxu0  ;;  %836 = vmatmul.mubr.msk.f32.gmra.mrb[2].mxu1 %vm184_vm0, %v317_v22 }
  0xf2   : > { %883 = vmatpush3.bf16.msra.mxu0 %v880_v23  ;;  %v305_v25 = vpop.f32.mrb[7].mxu0  ;;  %842 = vmatprep.mubr.msk.f32.mxu1 %vm184_vm0, %v314_v11 }
  0xf3   : > { %v884_v26 = vpack.c.bf16 %v827_v24, %v305_v25 }
  0xf5   : > { %885 = vmatprep.subr.bf16.mxu1 %v884_v26  ;;  %843 = vmatmul.mubr.msk.f32.vlgmr.msra.gmra.mrb[4].mxu1 %vm184_vm0, %v315_v17 }
  0xf6   : > { %887 = vmatpush3.bf16.msra.mxu1 %v884_v26  ;;  %845 = vmatprep.mubr.msk.f32.mxu1 %vm184_vm0, %v316_v19 }
  0xf7   : > { %853 = vmatmul.mubr.msk.f32.vlgmr.msra.gmra.mrb[8].mxu0 %vm184_vm0, %v315_v17 }
  0xf8   : > { %855 = vmatprep.mubr.msk.f32.mxu0 %vm184_vm0, %v316_v19 }
  0xf9   : > { %846 = vmatmul.mubr.msk.f32.gmra.mrb[6].mxu1 %vm184_vm0, %v317_v22 }
  0xfa   : > { %862 = vmatprep.mubr.msk.f32.mxu1 %vm184_vm0, %v314_v11 }
  0xfb   : > { %856 = vmatmul.mubr.msk.f32.gmra.mrb[10].mxu0 %vm184_vm0, %v317_v22 }
  0xfd   : > { %863 = vmatmul.mubr.msk.f32.vlgmr.msra.gmra.mrb[8].mxu1 %vm184_vm0, %v315_v17 }
  0xfe   : > { %865 = vmatprep.mubr.msk.f32.mxu1 %vm184_vm0, %v316_v19 }
 0x101   : > { %866 = vmatmul.mubr.msk.f32.gmra.mrb[10].mxu1 %vm184_vm0, %v317_v22 }
 0x1c0   : > { %v834_v27 = vpop.f32.mrb[0].mxu1 }
 0x1c1   : > { %417 = vst.msk [vmem:[%s984_s8 + $0x8] sm:$0xff] %vm415_vm1, %v834_v27  ;;  %v396_v28 = vpop.f32.mrb[1].mxu1 }
 0x1c2   : > { %416 = vst.msk [vmem:[%s984_s8] sm:$0xff] %vm415_vm1, %v396_v28 }
 0x1c4   : > { %v837_v29 = vpop.f32.mrb[2].mxu1 }
 0x1c5   : > { %419 = vst.msk [vmem:[%s984_s8 + $0x18] sm:$0xff] %vm415_vm1, %v837_v29  ;;  %v406_v30 = vpop.f32.mrb[3].mxu1 }
 0x1c6   : > { %418 = vst.msk [vmem:[%s984_s8 + $0x10] sm:$0xff] %vm415_vm1, %v406_v30 }
 0x1c8   : > { %v844_v31 = vpop.f32.mrb[4].mxu1 }
 0x1c9   : > { %506 = vst.msk [vmem:[%s984_s8 + $0x28] sm:$0xff] %vm415_vm1, %v844_v31  ;;  %v486_v32 = vpop.f32.mrb[5].mxu1 }
 0x1ca   : > { %505 = vst.msk [vmem:[%s984_s8 + $0x20] sm:$0xff] %vm415_vm1, %v486_v32  ;;  %v854_v33 = vpop.f32.mrb[8].mxu0 }
 0x1cb   : > { %595 = vst.msk [vmem:[%s984_s8 + $0x48] sm:$0xff] %vm415_vm1, %v854_v33  ;;  %v575_v34 = vpop.f32.mrb[9].mxu0 }
 0x1cc   : > { %v847_v35 = vpop.f32.mrb[6].mxu1  ;;  %594 = vst.msk [vmem:[%s984_s8 + $0x40] sm:$0xff] %vm415_vm1, %v575_v34 }
 0x1cd   : > { %508 = vst.msk [vmem:[%s984_s8 + $0x38] sm:$0xff] %vm415_vm1, %v847_v35  ;;  %v496_v36 = vpop.f32.mrb[7].mxu1 }
 0x1ce   : > { %507 = vst.msk [vmem:[%s984_s8 + $0x30] sm:$0xff] %vm415_vm1, %v496_v36  ;;  %v857_v37 = vpop.f32.mrb[10].mxu0 }
 0x1cf   : > { %597 = vst.msk [vmem:[%s984_s8 + $0x58] sm:$0xff] %vm415_vm1, %v857_v37  ;;  %v585_v38 = vpop.f32.mrb[11].mxu0 }
 0x1d0   : > { %v864_v39 = vpop.f32.mrb[8].mxu1  ;;  %596 = vst.msk [vmem:[%s984_s8 + $0x50] sm:$0xff] %vm415_vm1, %v585_v38 }
 0x1d1   : > { %684 = vst.msk [vmem:[%s984_s8 + $0x68] sm:$0xff] %vm415_vm1, %v864_v39  ;;  %v664_v40 = vpop.f32.mrb[9].mxu1 }
 0x1d2   : > { %683 = vst.msk [vmem:[%s984_s8 + $0x60] sm:$0xff] %vm415_vm1, %v664_v40 }
 0x1d4   : > { %v867_v41 = vpop.f32.mrb[10].mxu1 }
 0x1d5   : > { %686 = vst.msk [vmem:[%s984_s8 + $0x78] sm:$0xff] %vm415_vm1, %v867_v41  ;;  %v674_v42 = vpop.f32.mrb[11].mxu1 }
 0x1d6   : > { %685 = vst.msk [vmem:[%s984_s8 + $0x70] sm:$0xff] %vm415_vm1, %v674_v42 }
 0x1d7 PF: > { %s13_s12 = sadd.s32 1, %s902_s12  }
 0x1d8   : > { %p10_p5 = scmp.ge.s32.totalorder %s13_s12, 4  }
 0x1da   :  { %12 = sbr.rel (!%p10_p5) target bundleno = 1 (0x1), region = 62 }

</bundles_post_ra>
